<compile_context>
chip_gen: v7x
topology: tpu7x:2x2x1
jax: 0.10.0
libtpu: 0.0.40
codegen_flags: <defaults>
</compile_context>

<pallas_src>
import math

import jax
import jax.numpy as jnp
from jax.experimental import pallas as pl
from jax.experimental.pallas import tpu as pltpu

HIDDEN = 128          # hidden_channels (matches the original model)
NUM_GENRES = 3
OUT_PAD = 128         # lane-dense padded output width (sliced back to 3)
CAT = HIDDEN + OUT_PAD  # 256: width of the fused [hu | p2] operand
LANE = 128


# ----------------------------------------------------------------------------
# small helpers
# ----------------------------------------------------------------------------
def _pad_to(n, m):
    return ((n + m - 1) // m) * m


def _vmem_capacity():
    """Per-TensorCore VMEM capacity; conservative 64 MiB fallback (v7x)."""
    try:
        info = pltpu.get_tpu_info()
        cap = getattr(info, "vmem_capacity_bytes", None)
        if cap:
            return int(cap)
    except Exception:
        pass
    return 64 << 20


def _pow2_tile(n, cap):
    """Largest power-of-two multiple of 128 that is <= cap and not (much)
    larger than the 128-padded extent n."""
    t = LANE
    target = _pad_to(max(n, 1), LANE)
    while t * 2 <= cap and t < target:
        t *= 2
    return t


def _path_step_bytes(tr, tk, w_src, w_out):
    """Everything that actually lives in VMEM for one path-kernel grid step."""
    bf = 2
    return (2 * tr * tk * bf            # streamed A tile (double-buffered)
            + 2 * tk * w_src * bf       # streamed src K-tile (double-buffered)
            + 2 * tr * HIDDEN * bf      # dst row tile (double-buffered)
            + 2 * tr * w_out * bf       # output tile (double-buffered)
            + tr * CAT * 4              # f32 accumulator scratch (upper bound)
            + tr * 2 * HIDDEN * bf      # bf16 concat scratch
            + (2 << 20))                # weights / biases / compiler temps


def _choose_tiles(n_user, n_movie):
    """Generation-aware row/K tile choice.  tile_u is the user-row tile of the
    user path AND the user K-tile of the movie path (and symmetrically tile_m),
    so node counts only need padding to one tile each."""
    cap_bytes = _vmem_capacity()
    row_cap = 1024 if cap_bytes >= (100 << 20) else 512     # 128-MiB vs 64-MiB parts
    budget = min(int(cap_bytes * 0.75), cap_bytes - (12 << 20))

    def fits(tu, tm):
        user_path = _path_step_bytes(tu, tm, HIDDEN, CAT)
        movie_path = _path_step_bytes(tm, tu, CAT, OUT_PAD)
        return max(user_path, movie_path) <= budget

    tu = _pow2_tile(n_user, row_cap)
    tm = _pow2_tile(n_movie, row_cap)
    while not fits(tu, tm) and max(tu, tm) > LANE:
        if tu >= tm:
            tu = max(LANE, tu // 2)
        else:
            tm = max(LANE, tm // 2)
    return tu, tm


def _compiler_params(step_bytes, semantics):
    cap = _vmem_capacity()
    limit = int(min(cap - (4 << 20), max(32 << 20, step_bytes + (8 << 20))))
    return pltpu.CompilerParams(dimension_semantics=semantics,
                                vmem_limit_bytes=limit)


def _dense_mean_adj(edge_index, n_dst_pad, n_src_pad):
    """Dense row-normalized adjacency for mean aggregation at the destination.
    Degree normalisation in f32, then cast to bf16 for the kernel."""
    # TODO(synk): at real MovieLens scale the adjacency is ~0.1-1% dense;
    # replace this dense O(N^2) matrix with CSR neighbor lists + scalar-prefetch
    # gather (or per-(row,K)-block nonzero counts with @pl.when block skipping).
    src = edge_index[0]
    dst = edge_index[1]
    a = jnp.zeros((n_dst_pad, n_src_pad), jnp.float32).at[dst, src].add(1.0)
    deg = jnp.clip(jnp.sum(a, axis=1, keepdims=True), 1.0, None)
    return (a / deg).astype(jnp.bfloat16)


# ----------------------------------------------------------------------------
# kernels
# ----------------------------------------------------------------------------
def _linear_kernel(x_ref, w_ref, b_ref, o_ref):
    # o = x @ W + b (f32 accumulation, bf16 output)
    acc = jnp.dot(x_ref[...], w_ref[...], preferred_element_type=jnp.float32)
    o_ref[...] = (acc + b_ref[...]).astype(o_ref.dtype)


def _user_path_kernel(a_mu_ref, hm_ref, hu_ref, w1u_ref, b1u_ref, wl2m_ref,
                      out_ref, acc_ref, cat_ref):
    """Layer-1 SAGEConv for the 'user' destination, K-tiled over movie source
    nodes, fused with the reassociated layer-2 projection p2 = relu(u1) @ W_l2.
    Output block is the concatenated [hu | p2] operand for the movie path."""
    k = pl.program_id(1)

    @pl.when(k == 0)
    def _():
        acc_ref[...] = jnp.zeros_like(acc_ref)

    acc_ref[...] += jnp.dot(a_mu_ref[...], hm_ref[...],
                            preferred_element_type=jnp.float32)

    @pl.when(k == pl.num_programs(1) - 1)
    def _():
        hu = hu_ref[...]
        # single K=256 dot against [wl1u; wr1u]
        cat_ref[:, :HIDDEN] = acc_ref[...].astype(jnp.bfloat16)
        cat_ref[:, HIDDEN:] = hu
        u1 = (jnp.dot(cat_ref[...], w1u_ref[...],
                      preferred_element_type=jnp.float32) + b1u_ref[...])
        u1 = jnp.maximum(u1, 0.0).astype(jnp.bfloat16)  # relu; dropout(eval)=id
        p2 = jnp.dot(u1, wl2m_ref[...], preferred_element_type=jnp.float32)
        out_ref[:, :HIDDEN] = hu
        out_ref[:, HIDDEN:] = p2.astype(out_ref.dtype)


def _movie_path_kernel(a_um_ref, hup2_ref, hm_ref, w1m_ref, b1m_ref,
                       b2m_ref, wr2m_ref, out_ref, acc_ref, cat_ref):
    """Layer-1 + layer-2 SAGEConv for the 'movie' destination, K-tiled over
    user source nodes.  The two adjacency matmuls are fused into one N=256
    matmul against the concatenated [hu | p2] operand."""
    k = pl.program_id(1)

    @pl.when(k == 0)
    def _():
        acc_ref[...] = jnp.zeros_like(acc_ref)

    acc_ref[...] += jnp.dot(a_um_ref[...], hup2_ref[...],
                            preferred_element_type=jnp.float32)

    @pl.when(k == pl.num_programs(1) - 1)
    def _():
        agg = acc_ref[...]
        aggr_m = agg[:, :HIDDEN]        # A_um @ hu   (layer-1 mean aggregation)
        aggr2 = agg[:, HIDDEN:]         # A_um @ p2   (layer-2 aggregation)
        cat_ref[:, :HIDDEN] = aggr_m.astype(jnp.bfloat16)
        cat_ref[:, HIDDEN:] = hm_ref[...]
        m1 = (jnp.dot(cat_ref[...], w1m_ref[...],
                      preferred_element_type=jnp.float32) + b1m_ref[...])
        m1 = jnp.maximum(m1, 0.0).astype(jnp.bfloat16)
        out = aggr2 + b2m_ref[...] + jnp.dot(m1, wr2m_ref[...],
                                             preferred_element_type=jnp.float32)
        out_ref[...] = out.astype(out_ref.dtype)


# ----------------------------------------------------------------------------
# pallas_call wrappers
# ----------------------------------------------------------------------------
def _linear_call(x_pad, w, b, tile):
    n_pad, f_pad = x_pad.shape
    h = w.shape[1]
    step_bytes = (2 * tile * f_pad * 2 + 2 * tile * h * 2
                  + 2 * f_pad * h * 2 + (1 << 20))
    return pl.pallas_call(
        _linear_kernel,
        out_shape=jax.ShapeDtypeStruct((n_pad, h), jnp.bfloat16),
        grid=(n_pad // tile,),
        in_specs=[
            pl.BlockSpec((tile, f_pad), lambda i: (i, 0)),   # node-row tile
            pl.BlockSpec((f_pad, h), lambda i: (0, 0)),      # weight (small)
            pl.BlockSpec((1, h), lambda i: (0, 0)),          # bias (f32)
        ],
        out_specs=pl.BlockSpec((tile, h), lambda i: (i, 0)),
        compiler_params=_compiler_params(step_bytes, ("parallel",)),
    )(x_pad, w, b)


def _user_path_call(a_mu, hm, hu, w1u_cat, b1u, wl2m, tile_u, tile_m):
    nu_pad, nm_pad = a_mu.shape
    step_bytes = _path_step_bytes(tile_u, tile_m, HIDDEN, CAT)
    return pl.pallas_call(
        _user_path_kernel,
        out_shape=jax.ShapeDtypeStruct((nu_pad, CAT), jnp.bfloat16),
        grid=(nu_pad // tile_u, nm_pad // tile_m),
        in_specs=[
            pl.BlockSpec((tile_u, tile_m), lambda i, k: (i, k)),     # A_mu tile
            pl.BlockSpec((tile_m, HIDDEN), lambda i, k: (k, 0)),     # hm K-tile
            pl.BlockSpec((tile_u, HIDDEN), lambda i, k: (i, 0)),     # hu dst tile
            pl.BlockSpec((2 * HIDDEN, HIDDEN), lambda i, k: (0, 0)), # [wl1u;wr1u]
            pl.BlockSpec((1, HIDDEN), lambda i, k: (0, 0)),          # b1u (f32)
            pl.BlockSpec((HIDDEN, OUT_PAD), lambda i, k: (0, 0)),    # wl2m
        ],
        out_specs=pl.BlockSpec((tile_u, CAT), lambda i, k: (i, 0)),
        scratch_shapes=[pltpu.VMEM((tile_u, HIDDEN), jnp.float32),
                        pltpu.VMEM((tile_u, 2 * HIDDEN), jnp.bfloat16)],
        compiler_params=_compiler_params(step_bytes, ("parallel", "arbitrary")),
    )(a_mu, hm, hu, w1u_cat, b1u, wl2m)


def _movie_path_call(a_um, hup2, hm, w1m_cat, b1m, b2m, wr2m, tile_m, tile_u):
    nm_pad, nu_pad = a_um.shape
    step_bytes = _path_step_bytes(tile_m, tile_u, CAT, OUT_PAD)
    return pl.pallas_call(
        _movie_path_kernel,
        out_shape=jax.ShapeDtypeStruct((nm_pad, OUT_PAD), jnp.bfloat16),
        grid=(nm_pad // tile_m, nu_pad // tile_u),
        in_specs=[
            pl.BlockSpec((tile_m, tile_u), lambda i, k: (i, k)),     # A_um tile
            pl.BlockSpec((tile_u, CAT), lambda i, k: (k, 0)),        # [hu|p2] K-tile
            pl.BlockSpec((tile_m, HIDDEN), lambda i, k: (i, 0)),     # hm dst tile
            pl.BlockSpec((2 * HIDDEN, HIDDEN), lambda i, k: (0, 0)), # [wl1m;wr1m]
            pl.BlockSpec((1, HIDDEN), lambda i, k: (0, 0)),          # b1m (f32)
            pl.BlockSpec((1, OUT_PAD), lambda i, k: (0, 0)),         # b2m (f32)
            pl.BlockSpec((HIDDEN, OUT_PAD), lambda i, k: (0, 0)),    # wr2m
        ],
        out_specs=pl.BlockSpec((tile_m, OUT_PAD), lambda i, k: (i, 0)),
        scratch_shapes=[pltpu.VMEM((tile_m, CAT), jnp.float32),
                        pltpu.VMEM((tile_m, 2 * HIDDEN), jnp.bfloat16)],
        compiler_params=_compiler_params(step_bytes, ("parallel", "arbitrary")),
    )(a_um, hup2, hm, w1m_cat, b1m, b2m, wr2m)


# ----------------------------------------------------------------------------
# graph / parameter preparation (cacheable, outside the hot path)
# ----------------------------------------------------------------------------
def prepare_graph(x_dict, edge_index_dict):
    xu = x_dict['user'].astype(jnp.float32)
    xm = x_dict['movie'].astype(jnp.float32)
    n_user, uf = xu.shape
    n_movie, mf = xm.shape

    uf_pad = _pad_to(uf, LANE)
    mf_pad = _pad_to(mf, LANE)

    tile_u, tile_m = _choose_tiles(n_user, n_movie)
    nu_pad = _pad_to(n_user, tile_u)
    nm_pad = _pad_to(n_movie, tile_m)

    xu_p = jnp.zeros((nu_pad, uf_pad), jnp.bfloat16)
    xu_p = xu_p.at[:n_user, :uf].set(xu.astype(jnp.bfloat16))
    xm_p = jnp.zeros((nm_pad, mf_pad), jnp.bfloat16)
    xm_p = xm_p.at[:n_movie, :mf].set(xm.astype(jnp.bfloat16))

    e_um = edge_index_dict[('user', 'rates', 'movie')]     # row0 user src, row1 movie dst
    e_mu = edge_index_dict[('movie', 'rev_rates', 'user')] # row0 movie src, row1 user dst
    a_um = _dense_mean_adj(e_um, nm_pad, nu_pad)
    a_mu = _dense_mean_adj(e_mu, nu_pad, nm_pad)

    return dict(xu=xu_p, xm=xm_p, a_um=a_um, a_mu=a_mu,
                n_user=n_user, n_movie=n_movie,
                uf_pad=uf_pad, mf_pad=mf_pad,
                nu_pad=nu_pad, nm_pad=nm_pad,
                tile_u=tile_u, tile_m=tile_m)


def init_params(key, user_feat, movie_feat, hidden=HIDDEN, num_genres=NUM_GENRES):
    """Logical (unpadded) parameters: weights [in, out], biases [1, out], f32."""
    ks = jax.random.split(key, 13)

    def w(k, fi, fo):
        return jax.random.normal(k, (fi, fo), jnp.float32) * 0.1

    def b(k, fo):
        return jax.random.normal(k, (1, fo), jnp.float32) * 0.05

    return dict(
        wu=w(ks[0], user_feat, hidden),  bu=b(ks[1], hidden),       # user_lin
        wm=w(ks[2], movie_feat, hidden), bm=b(ks[3], hidden),       # movie_lin
        # layer-1 conv ('user','rates','movie'): lin_l (bias), lin_r (no bias)
        wl1m=w(ks[4], hidden, hidden), bl1m=b(ks[5], hidden), wr1m=w(ks[6], hidden, hidden),
        # layer-1 conv ('movie','rev_rates','user')
        wl1u=w(ks[7], hidden, hidden), bl1u=b(ks[8], hidden), wr1u=w(ks[9], hidden, hidden),
        # layer-2 conv ('user','rates','movie') -> num_genres
        wl2m=w(ks[10], hidden, num_genres), bl2m=b(ks[11], num_genres),
        wr2m=w(ks[12], hidden, num_genres),
    )


def pad_params(p, uf_pad, mf_pad):
    """Zero-pad to lane-friendly shapes; weights -> bf16, biases stay f32.
    Layer-1 lin_l/lin_r pairs are concatenated to a single (256,128) weight."""
    def padw(w, rows, cols):
        out = jnp.zeros((rows, cols), jnp.float32)
        return out.at[:w.shape[0], :w.shape[1]].set(w).astype(jnp.bfloat16)

    def padb(b, cols):
        out = jnp.zeros((1, cols), jnp.float32)
        return out.at[:, :b.shape[1]].set(b)

    w1m_cat = jnp.concatenate([padw(p['wl1m'], HIDDEN, HIDDEN),
                               padw(p['wr1m'], HIDDEN, HIDDEN)], axis=0)
    w1u_cat = jnp.concatenate([padw(p['wl1u'], HIDDEN, HIDDEN),
                               padw(p['wr1u'], HIDDEN, HIDDEN)], axis=0)

    return dict(
        wu=padw(p['wu'], uf_pad, HIDDEN), bu=padb(p['bu'], HIDDEN),
        wm=padw(p['wm'], mf_pad, HIDDEN), bm=padb(p['bm'], HIDDEN),
        w1m_cat=w1m_cat, b1m=padb(p['bl1m'], HIDDEN),
        w1u_cat=w1u_cat, b1u=padb(p['bl1u'], HIDDEN),
        wl2m=padw(p['wl2m'], HIDDEN, OUT_PAD), b2m=padb(p['bl2m'], OUT_PAD),
        wr2m=padw(p['wr2m'], HIDDEN, OUT_PAD),
    )


# ----------------------------------------------------------------------------
# forward
# ----------------------------------------------------------------------------
def forward_from_prepared(prep, pp):
    tile_u, tile_m = prep['tile_u'], prep['tile_m']
    # input projections (bf16 activations)
    hu = _linear_call(prep['xu'], pp['wu'], pp['bu'], tile_u)
    hm = _linear_call(prep['xm'], pp['wm'], pp['bm'], tile_m)
    # user destination path (layer 1) fused with reassociated layer-2 projection;
    # emits the concatenated [hu | p2] operand for the movie path
    hup2 = _user_path_call(prep['a_mu'], hm, hu,
                           pp['w1u_cat'], pp['b1u'], pp['wl2m'], tile_u, tile_m)
    # movie destination path (layer 1 + layer 2, fused N=256 adjacency matmul)
    out_pad = _movie_path_call(prep['a_um'], hup2, hm,
                               pp['w1m_cat'], pp['b1m'], pp['b2m'], pp['wr2m'],
                               tile_m, tile_u)
    return out_pad[:prep['n_movie'], :NUM_GENRES].astype(jnp.float32)


def model_forward(x_dict, edge_index_dict, params):
    prep = prepare_graph(x_dict, edge_index_dict)            # cache these two
    pp = pad_params(params, prep['uf_pad'], prep['mf_pad'])  # across repeated calls
    return forward_from_prepared(prep, pp)


def _reference_forward(x_dict, edge_index_dict, params):
    """Pure-JAX f32 reference (unpadded) for a sanity check."""
    xu = x_dict['user'].astype(jnp.float32)
    xm = x_dict['movie'].astype(jnp.float32)
    n_user, n_movie = xu.shape[0], xm.shape[0]

    def adj(e, nd, ns):
        a = jnp.zeros((nd, ns), jnp.float32).at[e[1], e[0]].add(1.0)
        deg = jnp.clip(a.sum(1, keepdims=True), 1.0, None)
        return a / deg

    a_um = adj(edge_index_dict[('user', 'rates', 'movie')], n_movie, n_user)
    a_mu = adj(edge_index_dict[('movie', 'rev_rates', 'user')], n_user, n_movie)
    hu = xu @ params['wu'] + params['bu']
    hm = xm @ params['wm'] + params['bm']
    m1 = jnp.maximum((a_um @ hu) @ params['wl1m'] + params['bl1m'] + hm @ params['wr1m'], 0.0)
    u1 = jnp.maximum((a_mu @ hm) @ params['wl1u'] + params['bl1u'] + hu @ params['wr1u'], 0.0)
    return (a_um @ u1) @ params['wl2m'] + params['bl2m'] + m1 @ params['wr2m']


if __name__ == "__main__":
    key = jax.random.PRNGKey(0)
    k_xu, k_xm, k_eu, k_em, k_p = jax.random.split(key, 5)

    n_user, n_movie = 16, 16
    user_feat, movie_feat = 24, 20
    n_edges = 64

    x_dict = {
        'user':  jax.random.normal(k_xu, (n_user, user_feat), jnp.float32),
        'movie': jax.random.normal(k_xm, (n_movie, movie_feat), jnp.float32),
    }

    users = jax.random.randint(k_eu, (n_edges,), 0, n_user)
    movies = jax.random.randint(k_em, (n_edges,), 0, n_movie)
    e_rates = jnp.stack([users, movies], axis=0)        # user -> movie
    e_rev = jnp.stack([movies, users], axis=0)          # movie -> user (ToUndirected)
    edge_index_dict = {
        ('user', 'rates', 'movie'): e_rates,
        ('movie', 'rev_rates', 'user'): e_rev,
    }

    params = init_params(k_p, user_feat, movie_feat)

    out = model_forward(x_dict, edge_index_dict, params)
    out = jax.block_until_ready(out)
    assert out.shape == (n_movie, NUM_GENRES)

    # loose tolerance: bf16 operands / intermediates with f32 accumulation,
    # plus the layer-2 reassociation A_um @ (u1 @ W_l2) vs (A_um @ u1) @ W_l2
    ref = _reference_forward(x_dict, edge_index_dict, params)
    assert float(jnp.max(jnp.abs(out - ref))) < 0.25

    print("KERNEL_OK")
</pallas_src>

<mosaic_0001>
module attributes {stable_mosaic.version = 11 : i64} {
  func.func @_linear_kernel(%arg0: i32, %arg1: memref<128x128xbf16, #tpu.memory_space<vmem>>, %arg2: memref<128x128xbf16, #tpu.memory_space<vmem>>, %arg3: memref<1x128xf32, #tpu.memory_space<vmem>>, %arg4: memref<128x128xbf16, #tpu.memory_space<vmem>>) attributes {dimension_semantics = [#tpu.dimension_semantics<parallel>], iteration_bounds = array<i64: 1>, scalar_prefetch = 0 : i64, scratch_operands = 0 : i64, tpu.core_type = #tpu.core_type<tc>, window_params = [{transform_indices = @transform_0, window_bounds = array<i64: 128, 128>}, {pipeline_mode = #tpu.pipeline_mode<synchronous>, transform_indices = @transform_1, window_bounds = array<i64: 128, 128>}, {pipeline_mode = #tpu.pipeline_mode<synchronous>, transform_indices = @transform_2, window_bounds = array<i64: 1, 128>}, {transform_indices = @transform_3, window_bounds = array<i64: 128, 128>}]} {
    %c0 = arith.constant 0 : index
    %c0_0 = arith.constant 0 : index
    %0 = vector.load %arg1[%c0, %c0_0] : memref<128x128xbf16, #tpu.memory_space<vmem>>, vector<128x128xbf16>
    %c0_1 = arith.constant 0 : index
    %c0_2 = arith.constant 0 : index
    %1 = vector.load %arg2[%c0_1, %c0_2] : memref<128x128xbf16, #tpu.memory_space<vmem>>, vector<128x128xbf16>
    %cst = arith.constant dense<0.000000e+00> : vector<128x128xf32>
    %2 = tpu.matmul %0, %1, %cst {dimension_numbers = #tpu.dot_dimension_numbers<[1], [0], [0], [1], [0, 0, 1, 1], [], []>} : vector<128x128xbf16>, vector<128x128xbf16>, vector<128x128xf32> -> vector<128x128xf32>
    %c0_3 = arith.constant 0 : index
    %c0_4 = arith.constant 0 : index
    %3 = vector.load %arg3[%c0_3, %c0_4] : memref<1x128xf32, #tpu.memory_space<vmem>>, vector<1x128xf32>
    %4 = vector.broadcast %3 : vector<1x128xf32> to vector<128x128xf32>
    %5 = arith.addf %2, %4 : vector<128x128xf32>
    %6 = arith.truncf %5 : vector<128x128xf32> to vector<128x128xbf16>
    %c0_5 = arith.constant 0 : index
    %c0_6 = arith.constant 0 : index
    %7 = vector.load %arg4[%c0_5, %c0_6] : memref<128x128xbf16, #tpu.memory_space<vmem>>, vector<128x128xbf16>
    tpu.vector_store %arg4[%c0_5, %c0_6], %6 {strides = array<i32>} : memref<128x128xbf16, #tpu.memory_space<vmem>>, vector<128x128xbf16>,
    return
  }
  func.func @transform_0(%arg0: i32) -> (i32, i32) {
    %c0_i32 = arith.constant 0 : i32
    %c0_i32_0 = arith.constant 0 : i32
    return %arg0, %c0_i32 : i32, i32
  }
  func.func @transform_1(%arg0: i32) -> (i32, i32) {
    %c0_i32 = arith.constant 0 : i32
    %c0_i32_0 = arith.constant 0 : i32
    %c0_i32_1 = arith.constant 0 : i32
    return %c0_i32, %c0_i32_0 : i32, i32
  }
  func.func @transform_2(%arg0: i32) -> (i32, i32) {
    %c0_i32 = arith.constant 0 : i32
    %c0_i32_0 = arith.constant 0 : i32
    %c0_i32_1 = arith.constant 0 : i32
    return %c0_i32, %c0_i32_0 : i32, i32
  }
  func.func @transform_3(%arg0: i32) -> (i32, i32) {
    %c0_i32 = arith.constant 0 : i32
    %c0_i32_0 = arith.constant 0 : i32
    return %arg0, %c0_i32 : i32, i32
  }
}

</mosaic_0001>

<bundles_post_ra>
// kernel: tpu_custom_call.1
= control target key start
LH: loop header
LB: loop body
LE: loop exit
PB: predicated region body
PF: predicated region fallthrough
CT: control target
= control target key end

     0   :  { %8 = vsyncpa [#allocation3], 0  ;;  %s700_s0 = inlined_call_operand.hbm [shape: bf16[128,128], index: 0, kind: input, shape index: {}]   ;;  %s701_s1 = inlined_call_operand.hbm [shape: bf16[128,128], index: 1, kind: input, shape index: {}]   ;;  %s702_s2 = inlined_call_operand.vmem [shape: f32[1,128], index: 2, kind: input, shape index: {}]   ;;  %s703_s3 = inlined_call_operand.hbm [shape: bf16[128,128], index: 3, kind: output, shape index: {}]  }
   0x1   :  { %9 = vsyncpa [#allocation6], 0 }
   0x2   :  { %10 = vsyncpa [#allocation4], 0  ;;  %s627_s12 = smov [#allocation2]   ;;  %s555_s16 = scalar_lea.hbm %s700_s0, 1024 }
   0x3   :  { %s16_s13 = sshll.u32 %s627_s12, 4  ;;  %p556_p0 = scmp.ne.s32.totalorder %s700_s0, %s555_s16  ;;  %s17_s13 = int_to_ptr.vmem [resolvable:$true] %s16_s13 }
   0x4   :  { %p559_p1 = scmp.lt.u32.totalorder %s555_s16, %s700_s0 }
   0x6   :  { %p561_p2 = pnand %p559_p1, %p556_p0 }
   0x8   :  { %564 = shalt.err (!%p561_p2)
}
   0x9   :  { %s565_s21 = scalar_lea.vmem %s17_s13, 1024  ;;  %p570_p4 = scmp.lt.s32.totalorder %s17_s13, %s17_s13 }
   0xa   :  { %p566_p3 = scmp.ne.s32.totalorder %s17_s13, %s565_s21  ;;  %p571_p5 = scmp.lt.s32.totalorder %s565_s21, %s565_s21 }
   0xc   :  { %p572_p6 = por %p571_p5, %p570_p4 }
   0xe   :  { %p573_p7 = pnand %p572_p6, %p566_p3 }
  0x10   :  { %576 = shalt.err (!%p573_p7)
}
  0x11   :  { %s628_s22 = smov 64   ;;  %s629_s23 = smov 4  }
  0x12   :  { %22 = dma.hbm_to_vmem [thread:$0]  %s700_s0, 1024, %s17_s13, [#allocation3], %s628_s22, %s628_s22, %s629_s23  }
  0x13   :  { %s630_s26 = smov [#allocation5]   ;;  %s577_s30 = scalar_lea.hbm %s701_s1, 1024 }
  0x14   :  { %s28_s27 = sshll.u32 %s630_s26, 4  ;;  %p578_p8 = scmp.ne.s32.totalorder %s701_s1, %s577_s30  ;;  %s29_s27 = int_to_ptr.vmem [resolvable:$true] %s28_s27 }
  0x15   :  { %p581_p9 = scmp.lt.u32.totalorder %s577_s30, %s701_s1 }
  0x17   :  { %p583_p10 = pnand %p581_p9, %p578_p8 }
  0x19   :  { %586 = shalt.err (!%p583_p10)
}
  0x1a   :  { %s587_s8 = scalar_lea.vmem %s29_s27, 1024  ;;  %p592_p12 = scmp.lt.s32.totalorder %s29_s27, %s29_s27 }
  0x1b   :  { %p588_p11 = scmp.ne.s32.totalorder %s29_s27, %s587_s8  ;;  %p593_p13 = scmp.lt.s32.totalorder %s587_s8, %s587_s8 }
  0x1d   :  { %p594_p0 = por %p593_p13, %p592_p12 }
  0x1f   :  { %p595_p1 = pnand %p594_p0, %p588_p11 }
  0x21   :  { %598 = shalt.err (!%p595_p1)
}
  0x22   :  { %34 = dma.hbm_to_vmem [thread:$0]  %s701_s1, 1024, %s29_s27, [#allocation6], %s628_s22, %s628_s22, %s629_s23  }
  0x23   :  { %621 = dma.done.wait [#allocation3], 1024  }
  0x24   :  { %622 = vsyncadd [#allocation3], 4294966272 }
  0x25   :  { %623 = dma.done.wait [#allocation6], 1024  }
  0x26   :  { %624 = vsyncadd [#allocation6], 4294966272  ;;  %v539_v0 = vld [vmem:[#allocation5] sm:$0xff]   ;;  %v540_v1 = vld [vmem:[#allocation5 + $0x8] sm:$0xff]  }
  0x27   :  { %486 = vmatprep.subr.bf16.mxu0 %v539_v0  ;;  %518 = vmatprep.subr.bf16.mxu1 %v539_v0  ;;  %v541_v2 = vld [vmem:[#allocation5 + $0x10] sm:$0xff]   ;;  %v542_v3 = vld [vmem:[#allocation5 + $0x18] sm:$0xff]   ;;  %v547_v4 = vld [vmem:[#allocation2] sm:$0xff]  }
  0x28   :  { %487 = vmatpush3.bf16.msra.mxu0 %v539_v0  ;;  %526 = vmatpush3.bf16.msra.mxu1 %v539_v0  ;;  %v548_v5 = vld [vmem:[#allocation2 + $0x20] sm:$0xff]   ;;  %v544_v7 = vld [vmem:[#allocation5 + $0x28] sm:$0xff]   ;;  %v545_v8 = vld [vmem:[#allocation5 + $0x30] sm:$0xff]  }
  0x29   :  { %488 = vmatprep.subr.bf16.mxu0 %v540_v1  ;;  %519 = vmatprep.subr.bf16.mxu1 %v540_v1  ;;  %v543_v6 = vld [vmem:[#allocation5 + $0x20] sm:$0xff]   ;;  %v546_v9 = vld [vmem:[#allocation5 + $0x38] sm:$0xff]   ;;  %v549_v10 = vld [vmem:[#allocation2 + $0x8] sm:$0xff]  }
  0x2a   :  { %502 = vmatprep.mubr.bf16.mxu0 %v547_v4  ;;  %510 = vmatprep.mubr.bf16.mxu1 %v548_v5  ;;  %v550_v11 = vld [vmem:[#allocation2 + $0x28] sm:$0xff]   ;;  %v551_v12 = vld [vmem:[#allocation2 + $0x10] sm:$0xff]   ;;  %v553_v14 = vld [vmem:[#allocation2 + $0x18] sm:$0xff]  }
  0x2b   :  { %v552_v13 = vld [vmem:[#allocation2 + $0x30] sm:$0xff]   ;;  %v554_v15 = vld [vmem:[#allocation2 + $0x38] sm:$0xff]   ;;  %v374_v17 = vld [vmem:[%s702_s2] ss:$0 sm:$0xff]  ;;  %s631_s2 = smov [#allocation7]  }
  0x2c   :  { %489 = vmatpush3.bf16.msra.mxu0 %v540_v1  ;;  %527 = vmatpush3.bf16.msra.mxu1 %v540_v1  ;;  %s361_s11 = sshll.u32 %s631_s2, 4  ;;  %s362_s11 = int_to_ptr.vmem [resolvable:$true] %s361_s11 }
  0x2d   :  { %490 = vmatprep.subr.bf16.mxu0 %v541_v2  ;;  %520 = vmatprep.subr.bf16.mxu1 %v541_v2  ;;  %s599_s12 = scalar_lea.vmem %s362_s11, 1024  ;;  %p604_p3 = scmp.lt.s32.totalorder %s362_s11, %s362_s11 }
  0x2e   :  { %p600_p2 = scmp.ne.s32.totalorder %s362_s11, %s599_s12  ;;  %p605_p4 = scmp.lt.s32.totalorder %s599_s12, %s599_s12 }
  0x30   :  { %491 = vmatpush3.bf16.msra.mxu0 %v541_v2  ;;  %528 = vmatpush3.bf16.msra.mxu1 %v541_v2  ;;  %p606_p5 = por %p605_p4, %p604_p3 }
  0x31   :  { %492 = vmatprep.subr.bf16.mxu0 %v542_v3  ;;  %521 = vmatprep.subr.bf16.mxu1 %v542_v3 }
  0x32   :  { %p607_p6 = pnand %p606_p5, %p600_p2 }
  0x34   :  { %493 = vmatpush3.bf16.msra.mxu0 %v542_v3  ;;  %529 = vmatpush3.bf16.msra.mxu1 %v542_v3 }
  0x35   :  { %494 = vmatprep.subr.bf16.mxu0 %v543_v6  ;;  %522 = vmatprep.subr.bf16.mxu1 %v543_v6 }
  0x38   :  { %495 = vmatpush3.bf16.msra.mxu0 %v543_v6  ;;  %530 = vmatpush3.bf16.msra.mxu1 %v543_v6 }
  0x39   :  { %496 = vmatprep.subr.bf16.mxu0 %v544_v7  ;;  %523 = vmatprep.subr.bf16.mxu1 %v544_v7 }
  0x3c   :  { %497 = vmatpush3.bf16.msra.mxu0 %v544_v7  ;;  %531 = vmatpush3.bf16.msra.mxu1 %v544_v7 }
  0x3d   :  { %498 = vmatprep.subr.bf16.mxu0 %v545_v8  ;;  %524 = vmatprep.subr.bf16.mxu1 %v545_v8 }
  0x40   :  { %499 = vmatpush3.bf16.msra.mxu0 %v545_v8  ;;  %532 = vmatpush3.bf16.msra.mxu1 %v545_v8 }
  0x41   :  { %500 = vmatprep.subr.bf16.mxu0 %v546_v9  ;;  %525 = vmatprep.subr.bf16.mxu1 %v546_v9 }
  0x44   :  { %501 = vmatpush3.bf16.msra.mxu0 %v546_v9  ;;  %533 = vmatpush3.bf16.msra.mxu1 %v546_v9 }
  0x47   :  { %503 = vmatmul.mubr.bf16.vlgmr.msra.gmra.mrb[0].mxu0 %v549_v10  ;;  %511 = vmatmul.mubr.bf16.vlgmr.msra.gmra.mrb[0].mxu1 %v550_v11 }
  0x48   :  { %506 = vmatprep.mubr.bf16.mxu0 %v551_v12  ;;  %514 = vmatprep.mubr.bf16.mxu1 %v552_v13 }
  0x4f   :  { %507 = vmatmul.mubr.bf16.gmra.mrb[4].mxu0 %v553_v14  ;;  %515 = vmatmul.mubr.bf16.gmra.mrb[4].mxu1 %v554_v15 }
 0x11a   :  { %v504_v16 = vpop.f32.mrb[0].mxu0  ;;  %v512_v18 = vpop.f32.mrb[0].mxu1 }
 0x11b   :  { %v213_v19 = vpop.f32.mrb[1].mxu0  ;;  %v245_v20 = vpop.f32.mrb[1].mxu1  ;;  %v222_v23 = vadd.f32 %v504_v16, %v374_v17  ;;  %v254_v24 = vadd.f32 %v512_v18, %v374_v17 }
 0x11c   :  { %v505_v21 = vpop.f32.mrb[2].mxu0  ;;  %v513_v22 = vpop.f32.mrb[2].mxu1  ;;  %v214_v29 = vadd.f32 %v374_v17, %v213_v19  ;;  %v246_v30 = vadd.f32 %v374_v17, %v245_v20 }
 0x11d   :  { %v225_v25 = vadd.f32 %v505_v21, %v374_v17  ;;  %v257_v26 = vadd.f32 %v513_v22, %v374_v17  ;;  %v216_v27 = vpop.f32.mrb[3].mxu0  ;;  %v248_v28 = vpop.f32.mrb[3].mxu1 }
 0x11e   :  { %v217_v31 = vadd.f32 %v374_v17, %v216_v27  ;;  %v249_v32 = vadd.f32 %v374_v17, %v248_v28 }
 0x11f   :  { %v431_v33 = vpack.c.bf16 %v225_v25, %v222_v23  ;;  %v451_v34 = vpack.c.bf16 %v257_v26, %v254_v24 }
 0x120   :  { %v426_v35 = vpack.c.bf16 %v217_v31, %v214_v29  ;;  %v446_v36 = vpack.c.bf16 %v249_v32, %v246_v30 }
 0x121   :  { %463 = vst [vmem:[#allocation7 + $0x8] sm:$0xff] %v431_v33   ;;  %467 = vst [vmem:[#allocation7 + $0x28] sm:$0xff] %v451_v34  }
 0x122   :  { %427 = vst [vmem:[#allocation7] sm:$0xff] %v426_v35   ;;  %466 = vst [vmem:[#allocation7 + $0x20] sm:$0xff] %v446_v36   ;;  %v508_v37 = vpop.f32.mrb[4].mxu0  ;;  %v516_v38 = vpop.f32.mrb[4].mxu1 }
 0x123   :  { %v229_v39 = vpop.f32.mrb[5].mxu0  ;;  %v261_v40 = vpop.f32.mrb[5].mxu1  ;;  %v238_v43 = vadd.f32 %v508_v37, %v374_v17  ;;  %v270_v44 = vadd.f32 %v516_v38, %v374_v17 }
 0x124   :  { %v509_v41 = vpop.f32.mrb[6].mxu0  ;;  %v517_v42 = vpop.f32.mrb[6].mxu1  ;;  %v230_v49 = vadd.f32 %v374_v17, %v229_v39  ;;  %v262_v50 = vadd.f32 %v374_v17, %v261_v40 }
 0x125   :  { %v241_v45 = vadd.f32 %v509_v41, %v374_v17  ;;  %v273_v46 = vadd.f32 %v517_v42, %v374_v17  ;;  %v232_v47 = vpop.f32.mrb[7].mxu0  ;;  %v264_v48 = vpop.f32.mrb[7].mxu1 }
 0x126   :  { %v233_v51 = vadd.f32 %v374_v17, %v232_v47  ;;  %v265_v52 = vadd.f32 %v374_v17, %v264_v48 }
 0x127   :  { %v441_v53 = vpack.c.bf16 %v241_v45, %v238_v43  ;;  %v461_v54 = vpack.c.bf16 %v273_v46, %v270_v44 }
 0x128   :  { %v436_v55 = vpack.c.bf16 %v233_v51, %v230_v49  ;;  %v456_v56 = vpack.c.bf16 %v265_v52, %v262_v50 }
 0x129   :  { %465 = vst [vmem:[#allocation7 + $0x18] sm:$0xff] %v441_v53   ;;  %469 = vst [vmem:[#allocation7 + $0x38] sm:$0xff] %v461_v54  }
 0x12a   :  { %464 = vst [vmem:[#allocation7 + $0x10] sm:$0xff] %v436_v55   ;;  %468 = vst [vmem:[#allocation7 + $0x30] sm:$0xff] %v456_v56  }
 0x12b   :  { %610 = shalt.err (!%p607_p6)
}
 0x12c   :  { %s611_s15 = scalar_lea.hbm %s703_s3, 1024 }
 0x12d   :  { %p612_p7 = scmp.ne.s32.totalorder %s703_s3, %s611_s15  ;;  %p615_p8 = scmp.lt.u32.totalorder %s611_s15, %s703_s3 }
 0x12f   :  { %p617_p9 = pnand %p615_p8, %p612_p7 }
 0x131   :  { %620 = shalt.err (!%p617_p9)
}
 0x132   :  { %367 = dma.vmem_to_hbm [thread:$0]  %s362_s11, 1024, %s703_s3, [#allocation4], %s628_s22, %s628_s22, %s629_s23  }
 0x133   :  { %625 = dma.done.wait [#allocation4], 1024  }
 0x134   :  { %626 = vsyncadd [#allocation4], 4294966272 }
 0x135   :  { %371 = vsyncpa [#allocation3], 1 }
 0x136   :  { %372 = vsyncpa [#allocation6], 1 }
 0x137   :  { %373 = vsyncpa [#allocation4], 1 }

</bundles_post_ra>
